<compile_context>
chip_gen: v6e
topology: v6e:2x2x1
jax: 0.10.0
libtpu: 0.0.40
codegen_flags: <defaults>
</compile_context>

<pallas_src>
import math

import jax
import jax.numpy as jnp
from jax.experimental import pallas as pl
from jax.experimental.pallas import tpu as pltpu


def _gelu_tanh(x):
    # 0.5 * x * (1 + tanh(sqrt(2/pi) * (x + 0.044715 * x^3)))
    c = math.sqrt(2.0 / math.pi)
    return 0.5 * x * (1.0 + jnp.tanh(c * (x + 0.044715 * x * x * x)))


def mlp_kernel(x_ref, w1_ref, b1_ref, w2_ref, b2_ref, o_ref, acc_ref):
    # x_ref:  (tm, E)   tile of flattened (B*T, E) input rows
    # w1_ref: (E, th)   fc1 weight slab for the current hidden tile
    # b1_ref: (1, th)   fc1 bias slab
    # w2_ref: (th, E)   fc2 weight slab for the current hidden tile
    # b2_ref: (1, E)    fc2 bias (added only at finalize)
    # o_ref:  (tm, E)   output tile (written only at the last hidden step)
    # acc_ref:(tm, E)   f32 accumulator scratch (resident across hidden axis)
    h_idx = pl.program_id(1)

    @pl.when(h_idx == 0)
    def _():
        acc_ref[...] = jnp.zeros_like(acc_ref)

    # fc1 slab (MXU, f32 accumulation) + bias + GELU(tanh) in f32.
    h = jnp.dot(x_ref[...], w1_ref[...], preferred_element_type=jnp.float32)
    h = _gelu_tanh(h + b1_ref[...].astype(jnp.float32))

    # Partial fc2: accumulate this hidden slab's contribution in f32.
    acc_ref[...] += jnp.dot(h.astype(w2_ref.dtype), w2_ref[...],
                            preferred_element_type=jnp.float32)

    @pl.when(h_idx == pl.num_programs(1) - 1)
    def _():
        # b2 added exactly once per output tile, in the epilogue.
        y = acc_ref[...] + b2_ref[...].astype(jnp.float32)
        # Dropout: inference-mode identity.
        # TODO(synk): training-mode dropout (mask + 1/(1-p) scale) would use
        # pltpu.prng_seed / pltpu.prng_random_bits; omitted for eval semantics.
        o_ref[...] = y.astype(o_ref.dtype)


def _round_up(a, m):
    return (a + m - 1) // m * m


def _pick_hidden_tile(H, tile_hidden):
    """Largest multiple of 128 that divides H and is <= tile_hidden, else H."""
    if H <= tile_hidden:
        return H
    cand = (tile_hidden // 128) * 128
    while cand >= 128 and H % cand != 0:
        cand -= 128
    return cand if cand >= 128 else H


def mlp_forward(x, w1, b1, w2, b2, *, tile_rows=512, tile_hidden=512):
    """x: [B, T, E]. Weights: w1 [E, 4E], w2 [4E, E]. Returns [B, T, E].

    Dropout is identity (eval-mode semantics).
    """
    B, T, E = x.shape
    E_in, H = w1.shape
    assert E_in == E and w2.shape == (H, E)
    assert b1.shape[-1] == H and b2.shape[-1] == E

    rows = B * T

    # Row tile: multiple of 8, capped by tile_rows; pad rows up to a tile.
    tm = min(tile_rows, _round_up(rows, 8))
    rows_pad = _round_up(rows, tm)

    # Hidden tile: divides H, lane-aligned (multiple of 128) when possible.
    th = _pick_hidden_tile(H, tile_hidden)

    x2d = x.reshape(rows, E)
    if rows_pad != rows:
        x2d = jnp.pad(x2d, ((0, rows_pad - rows), (0, 0)))
    b1_2d = b1.reshape(1, H)
    b2_2d = b2.reshape(1, E)

    # VMEM footprint estimate (double-buffered inputs/outputs + scratch) and
    # an explicit scoped-VMEM limit with headroom (capped for v7x's 64 MiB).
    itm = x2d.dtype.itemsize
    footprint = (
        2 * tm * E * itm                     # x tile (double-buffered)
        + 2 * E * th * w1.dtype.itemsize     # w1 slab
        + 2 * th * E * w2.dtype.itemsize     # w2 slab
        + 2 * th * b1.dtype.itemsize         # b1 slab
        + 2 * E * b2.dtype.itemsize          # b2
        + 2 * tm * E * x2d.dtype.itemsize    # out tile (double-buffered)
        + tm * E * 4                         # f32 accumulator
        + tm * th * 4                        # f32 GELU intermediate
    )
    vmem_limit = int(min(max(2 * footprint, 32 << 20), 64 << 20))

    grid = (rows_pad // tm, H // th)

    out2d = pl.pallas_call(
        mlp_kernel,
        out_shape=jax.ShapeDtypeStruct((rows_pad, E), x.dtype),
        grid_spec=pltpu.PrefetchScalarGridSpec(
            num_scalar_prefetch=0,
            grid=grid,
            in_specs=[
                pl.BlockSpec((tm, E), lambda i, h: (i, 0)),   # x rows tile
                pl.BlockSpec((E, th), lambda i, h: (0, h)),   # w1 hidden slab
                pl.BlockSpec((1, th), lambda i, h: (0, h)),   # b1 hidden slab
                pl.BlockSpec((th, E), lambda i, h: (h, 0)),   # w2 hidden slab
                pl.BlockSpec((1, E), lambda i, h: (0, 0)),    # b2
            ],
            out_specs=pl.BlockSpec((tm, E), lambda i, h: (i, 0)),
            scratch_shapes=[pltpu.VMEM((tm, E), jnp.float32)],
        ),
        compiler_params=pltpu.CompilerParams(
            dimension_semantics=("parallel", "arbitrary"),
            vmem_limit_bytes=vmem_limit,
        ),
    )(x2d, w1, b1_2d, w2, b2_2d)

    return out2d[:rows].reshape(B, T, E)


def init_mlp_params(key, embed_dim, dtype=jnp.float32):
    """Deterministic nn.Linear-style init: U(-1/sqrt(fan_in), 1/sqrt(fan_in))."""
    hidden = 4 * embed_dim
    k1, k2, k3, k4 = jax.random.split(key, 4)

    bound1 = 1.0 / math.sqrt(embed_dim)
    # stored as [in, out] so kernel computes x @ W
    w1 = jax.random.uniform(k1, (embed_dim, hidden), jnp.float32, -bound1, bound1)
    b1 = jax.random.uniform(k2, (hidden,), jnp.float32, -bound1, bound1)

    bound2 = 1.0 / math.sqrt(hidden)
    w2 = jax.random.uniform(k3, (hidden, embed_dim), jnp.float32, -bound2, bound2)
    b2 = jax.random.uniform(k4, (embed_dim,), jnp.float32, -bound2, bound2)
    return (w1.astype(dtype), b1.astype(dtype),
            w2.astype(dtype), b2.astype(dtype))


def _reference(x, w1, b1, w2, b2):
    B, T, E = x.shape
    h = _gelu_tanh(x.reshape(-1, E).astype(jnp.float32)
                   @ w1.astype(jnp.float32) + b1.astype(jnp.float32))
    y = h @ w2.astype(jnp.float32) + b2.astype(jnp.float32)
    return y.reshape(B, T, E)


if __name__ == "__main__":
    key = jax.random.PRNGKey(0)
    kx, kp, kx2 = jax.random.split(key, 3)

    # Small, lane-dense demo shapes: batch=2, seq=8, embed=128 -> hidden=512.
    B, T, E = 2, 8, 128
    x = jax.random.normal(kx, (B, T, E), dtype=jnp.float32)
    w1, b1, w2, b2 = init_mlp_params(kp, E)

    # Force multiple hidden-tile steps (512/128 = 4) to exercise the
    # accumulator init/accumulate/finalize path at small scale.
    out = mlp_forward(x, w1, b1, w2, b2, tile_rows=256, tile_hidden=128)
    out = jax.block_until_ready(out)
    ref = _reference(x, w1, b1, w2, b2)
    assert jnp.allclose(out, ref, atol=1e-5, rtol=1e-5), "mismatch vs reference"

    # Ragged row count (B*T not a multiple of the tile) exercises the
    # wrapper-side padding path, with default (large) tiles.
    Tr = 5
    xr = jax.random.normal(kx2, (B, Tr, E), dtype=jnp.float32)
    out_r = mlp_forward(xr, w1, b1, w2, b2)
    out_r = jax.block_until_ready(out_r)
    ref_r = _reference(xr, w1, b1, w2, b2)
    assert jnp.allclose(out_r, ref_r, atol=1e-5, rtol=1e-5), "ragged mismatch"

    print("KERNEL_OK")
</pallas_src>

<mosaic_0001>
module attributes {stable_mosaic.version = 11 : i64} {
  func.func @mlp_kernel(%arg0: i32, %arg1: i32, %arg2: memref<16x128xf32, #tpu.memory_space<vmem>>, %arg3: memref<128x128xf32, #tpu.memory_space<vmem>>, %arg4: memref<1x128xf32, #tpu.memory_space<vmem>>, %arg5: memref<128x128xf32, #tpu.memory_space<vmem>>, %arg6: memref<1x128xf32, #tpu.memory_space<vmem>>, %arg7: memref<16x128xf32, #tpu.memory_space<vmem>>, %arg8: memref<16x128xf32, #tpu.memory_space<vmem>>) attributes {dimension_semantics = [#tpu.dimension_semantics<parallel>, #tpu.dimension_semantics<arbitrary>], iteration_bounds = array<i64: 1, 4>, scalar_prefetch = 0 : i64, scratch_operands = 1 : i64, tpu.core_type = #tpu.core_type<tc>, window_params = [{transform_indices = @transform_0, window_bounds = array<i64: 16, 128>}, {transform_indices = @transform_1, window_bounds = array<i64: 128, 128>}, {transform_indices = @transform_2, window_bounds = array<i64: 1, 128>}, {transform_indices = @transform_3, window_bounds = array<i64: 128, 128>}, {pipeline_mode = #tpu.pipeline_mode<synchronous>, transform_indices = @transform_4, window_bounds = array<i64: 1, 128>}, {transform_indices = @transform_5, window_bounds = array<i64: 16, 128>}]} {
    %c0_i32 = arith.constant 0 : i32
    %0 = arith.cmpi eq, %arg1, %c0_i32 : i32
    %1 = arith.extui %0 : i1 to i32
    %c0_i32_0 = arith.constant 0 : i32
    %2 = arith.cmpi ne, %1, %c0_i32_0 : i32
    scf.if %2 {
      %cst_18 = arith.constant 0.000000e+00 : f32
      %30 = vector.broadcast %cst_18 : f32 to vector<16x128xf32>
      %c0_19 = arith.constant 0 : index
      %c0_20 = arith.constant 0 : index
      %31 = vector.load %arg8[%c0_19, %c0_20] : memref<16x128xf32, #tpu.memory_space<vmem>>, vector<16x128xf32>
      tpu.vector_store %arg8[%c0_19, %c0_20], %30 {strides = array<i32>} : memref<16x128xf32, #tpu.memory_space<vmem>>, vector<16x128xf32>,
    } else {
    }
    %c0 = arith.constant 0 : index
    %c0_1 = arith.constant 0 : index
    %3 = vector.load %arg2[%c0, %c0_1] : memref<16x128xf32, #tpu.memory_space<vmem>>, vector<16x128xf32>
    %c0_2 = arith.constant 0 : index
    %c0_3 = arith.constant 0 : index
    %4 = vector.load %arg3[%c0_2, %c0_3] : memref<128x128xf32, #tpu.memory_space<vmem>>, vector<128x128xf32>
    %cst = arith.constant dense<0.000000e+00> : vector<16x128xf32>
    %5 = tpu.matmul %3, %4, %cst {dimension_numbers = #tpu.dot_dimension_numbers<[1], [0], [0], [1], [0, 0, 1, 1], [], []>} : vector<16x128xf32>, vector<128x128xf32>, vector<16x128xf32> -> vector<16x128xf32>
    %c0_4 = arith.constant 0 : index
    %c0_5 = arith.constant 0 : index
    %6 = vector.load %arg4[%c0_4, %c0_5] : memref<1x128xf32, #tpu.memory_space<vmem>>, vector<1x128xf32>
    %7 = vector.broadcast %6 : vector<1x128xf32> to vector<16x128xf32>
    %8 = arith.addf %5, %7 : vector<16x128xf32>
    %cst_6 = arith.constant 5.000000e-01 : f32
    %9 = vector.broadcast %cst_6 : f32 to vector<16x128xf32>
    %10 = arith.mulf %9, %8 : vector<16x128xf32>
    %cst_7 = arith.constant 4.471500e-02 : f32
    %11 = vector.broadcast %cst_7 : f32 to vector<16x128xf32>
    %12 = arith.mulf %11, %8 : vector<16x128xf32>
    %13 = arith.mulf %12, %8 : vector<16x128xf32>
    %14 = arith.mulf %13, %8 : vector<16x128xf32>
    %15 = arith.addf %8, %14 : vector<16x128xf32>
    %cst_8 = arith.constant 0.797884583 : f32
    %16 = vector.broadcast %cst_8 : f32 to vector<16x128xf32>
    %17 = arith.mulf %16, %15 : vector<16x128xf32>
    %18 = math.tanh %17 : vector<16x128xf32>
    %cst_9 = arith.constant 1.000000e+00 : f32
    %19 = vector.broadcast %cst_9 : f32 to vector<16x128xf32>
    %20 = arith.addf %19, %18 : vector<16x128xf32>
    %21 = arith.mulf %10, %20 : vector<16x128xf32>
    %c0_10 = arith.constant 0 : index
    %c0_11 = arith.constant 0 : index
    %22 = vector.load %arg8[%c0_10, %c0_11] : memref<16x128xf32, #tpu.memory_space<vmem>>, vector<16x128xf32>
    %c0_12 = arith.constant 0 : index
    %c0_13 = arith.constant 0 : index
    %23 = vector.load %arg5[%c0_12, %c0_13] : memref<128x128xf32, #tpu.memory_space<vmem>>, vector<128x128xf32>
    %cst_14 = arith.constant dense<0.000000e+00> : vector<16x128xf32>
    %24 = tpu.matmul %21, %23, %cst_14 {dimension_numbers = #tpu.dot_dimension_numbers<[1], [0], [0], [1], [0, 0, 1, 1], [], []>} : vector<16x128xf32>, vector<128x128xf32>, vector<16x128xf32> -> vector<16x128xf32>
    %25 = arith.addf %22, %24 : vector<16x128xf32>
    %c0_15 = arith.constant 0 : index
    %c0_16 = arith.constant 0 : index
    %26 = vector.load %arg8[%c0_15, %c0_16] : memref<16x128xf32, #tpu.memory_space<vmem>>, vector<16x128xf32>
    tpu.vector_store %arg8[%c0_15, %c0_16], %25 {strides = array<i32>} : memref<16x128xf32, #tpu.memory_space<vmem>>, vector<16x128xf32>,
    %c3_i32 = arith.constant 3 : i32
    %27 = arith.cmpi eq, %arg1, %c3_i32 : i32
    %28 = arith.extui %27 : i1 to i32
    %c0_i32_17 = arith.constant 0 : i32
    %29 = arith.cmpi ne, %28, %c0_i32_17 : i32
    scf.if %29 {
      %c0_18 = arith.constant 0 : index
      %c0_19 = arith.constant 0 : index
      %30 = vector.load %arg8[%c0_18, %c0_19] : memref<16x128xf32, #tpu.memory_space<vmem>>, vector<16x128xf32>
      %c0_20 = arith.constant 0 : index
      %c0_21 = arith.constant 0 : index
      %31 = vector.load %arg6[%c0_20, %c0_21] : memref<1x128xf32, #tpu.memory_space<vmem>>, vector<1x128xf32>
      %32 = vector.broadcast %31 : vector<1x128xf32> to vector<16x128xf32>
      %33 = arith.addf %30, %32 : vector<16x128xf32>
      %c0_22 = arith.constant 0 : index
      %c0_23 = arith.constant 0 : index
      %34 = vector.load %arg7[%c0_22, %c0_23] : memref<16x128xf32, #tpu.memory_space<vmem>>, vector<16x128xf32>
      tpu.vector_store %arg7[%c0_22, %c0_23], %33 {strides = array<i32>} : memref<16x128xf32, #tpu.memory_space<vmem>>, vector<16x128xf32>,
    } else {
    }
    return
  }
  func.func @transform_0(%arg0: i32, %arg1: i32) -> (i32, i32) {
    %c0_i32 = arith.constant 0 : i32
    %c0_i32_0 = arith.constant 0 : i32
    return %arg0, %c0_i32 : i32, i32
  }
  func.func @transform_1(%arg0: i32, %arg1: i32) -> (i32, i32) {
    %c0_i32 = arith.constant 0 : i32
    %c0_i32_0 = arith.constant 0 : i32
    return %c0_i32, %arg1 : i32, i32
  }
  func.func @transform_2(%arg0: i32, %arg1: i32) -> (i32, i32) {
    %c0_i32 = arith.constant 0 : i32
    %c0_i32_0 = arith.constant 0 : i32
    return %c0_i32, %arg1 : i32, i32
  }
  func.func @transform_3(%arg0: i32, %arg1: i32) -> (i32, i32) {
    %c0_i32 = arith.constant 0 : i32
    %c0_i32_0 = arith.constant 0 : i32
    return %arg1, %c0_i32 : i32, i32
  }
  func.func @transform_4(%arg0: i32, %arg1: i32) -> (i32, i32) {
    %c0_i32 = arith.constant 0 : i32
    %c0_i32_0 = arith.constant 0 : i32
    %c0_i32_1 = arith.constant 0 : i32
    return %c0_i32, %c0_i32_0 : i32, i32
  }
  func.func @transform_5(%arg0: i32, %arg1: i32) -> (i32, i32) {
    %c0_i32 = arith.constant 0 : i32
    %c0_i32_0 = arith.constant 0 : i32
    return %arg0, %c0_i32 : i32, i32
  }
}

</mosaic_0001>

<bundles_post_ra>
// kernel: tpu_custom_call.1
= control target key start
LH: loop header
LB: loop body
LE: loop exit
PB: predicated region body
PF: predicated region fallthrough
CT: control target
= control target key end

     0   :  { %s1409_s0 = inlined_call_operand.hbm [shape: f32[16,128], index: 0, kind: input, shape index: {}]   ;;  %s1410_s1 = inlined_call_operand.hbm [shape: f32[128,512], index: 1, kind: input, shape index: {}]   ;;  %s1411_s2 = inlined_call_operand.hbm [shape: f32[1,512], index: 2, kind: input, shape index: {}]   ;;  %s1412_s3 = inlined_call_operand.hbm [shape: f32[512,128], index: 3, kind: input, shape index: {}]   ;;  %s1413_s4 = inlined_call_operand.vmem [shape: f32[1,128], index: 4, kind: input, shape index: {}]   ;;  %s1414_s5 = inlined_call_operand.hbm [shape: f32[16,128], index: 5, kind: output, shape index: {}]  }
   0x1   :  { %1423 = sst [smem:[#allocation16_spill]] %s1410_s1 }
   0x2   :  { %10 = vsyncpa [#allocation4], 0 }
   0x3   :  { %11 = vsyncpa [#allocation7], 0 }
   0x4   :  { %13 = vsyncpa [#allocation7 + $0x1], 0 }
   0x5   :  { %14 = vsyncpa [#allocation10], 0 }
   0x6   :  { %16 = vsyncpa [#allocation10 + $0x1], 0 }
   0x7   :  { %17 = vsyncpa [#allocation5], 0  ;;  %s1170_s18 = smov 0   ;;  %s1172_s19 = smov 0  }
   0x8   :  { %s1174_s20 = smov 0   ;;  %s1176_s21 = smov 0  }
   0x9   :  { %s1178_s22 = smov 0   ;;  %s1180_s23 = smov 0  }
   0xa LB: > { %s32_s24 = sadd.s32 1, %s1123_s22  ;;  %s68_s25 = sadd.s32 1, %s1115_s20  ;;  %s1127_s23 = sphi %s1180_s23, %s23_s23   ;;  %s1123_s22 = sphi %s1178_s22, %s1441_s22   ;;  %s1119_s21 = sphi %s1176_s21, %s1440_s21   ;;  %s1115_s20 = sphi %s1174_s20, %s1439_s20   ;;  %s1111_s19 = sphi %s1172_s19, %s1438_s19   ;;  %s1107_s18 = sphi %s1170_s18, %s1437_s18  }
   0xb   : > { %p33_p0 = scmp.ge.s32.totalorder %s32_s24, 4  ;;  %p75_p1 = scmp.ne.s32.totalorder %s1115_s20, %s1111_s19 }
   0xc   : > { %p76_p2 = scmp.eq.s32.totalorder %s1127_s23, 0  ;;  %p867_p5 = scmp.lt.s32.totalorder %s1127_s23, 4 }
   0xd   : > { %s1443_s24 = smov (%p33_p0, %s32_s24), 0  ;;  %s223_s28 = sand.u32 1, %s1127_s23  }
   0xe   : > { %p1207_p3 = por %p76_p2, %p75_p1  ;;  %s65_s27 = ssub.s32 %s1123_s22, %s1443_s24 }
   0xf   : > { %p66_p4 = scmp.eq.s32.totalorder %s65_s27, 0  ;;  %s1216_s29 = sand.u32 1, %s1115_s20  }
  0x10   : > { %s1415_s6 = sshll.u32 %s1216_s29, 7  ;;  %s714_s7 = sshll.u32 %s1123_s22, 7 }
  0x11   : > { %s1219_s30 = scalar_select %p66_p4, %s1115_s20, %s68_s25  }
  0x12   : > { %s1425_s1 = sld [smem:[#allocation16_spill]]  ;;  %s227_s11 = scalar_lea.vmem [#allocation6], %s1415_s6 }
  0x13   : > { %s233_s12 = sshll.u32 %s227_s11, 4  ;;  %p1230_p6 = pnand %p867_p5, %p1207_p3  ;;  %s234_s12 = int_to_ptr.vmem [resolvable:$true] %s233_s12 }
  0x14   : > { %s1234_s14 = scalar_lea.sflag [#allocation7], %s223_s28  ;;  %s944_s15 = scalar_lea.vmem %s234_s12, 2048 }
  0x15   : > { %p1421_p7 = pneg %p1230_p6  ;;  %p945_p8 = scmp.ne.s32.totalorder %s234_s12, %s944_s15 }
  0x16   : > { %s1129_s16 = smov [#allocation6]  }
  0x17   : > { %p947_p9 = pnand %p945_p8, %p1421_p7  ;;  %s949_s17 = sshll.u32 %s1129_s16, 4  ;;  %s950_s17 = int_to_ptr.vmem [resolvable:$false] %s949_s17 }
  0x18   : > { %s232_s10 = scalar_lea.hbm %s1425_s1, %s714_s7  ;;  %s951_s25 = scalar_lea.vmem %s950_s17, 4096 }
  0x19   : > { %p948_p10 = pneg %p947_p9  ;;  %p952_p11 = scmp.lt.s32.totalorder %s234_s12, %s950_s17 }
  0x1a   : > { %p953_p12 = scmp.lt.s32.totalorder %s951_s25, %s944_s15 }
  0x1c   : > { %p954_p13 = por %p953_p12, %p952_p11 }
  0x1e   : > { %p955_p0 = pnand %p954_p13, %p948_p10 }
  0x20   : > { %958 = shalt.err (!%p955_p0)
}
  0x21   : > { %s1130_s26 = smov 512   ;;  %s1416_s27 = smov 128  }
  0x22   : > { %s1418_s28 = smov 8   ;;  %s1247_s7 = sadd.s32 4294967295, %s1127_s23  }
  0x23   : > { %859 = dma.hbm_to_vmem [thread:$0]  (!%p1230_p6), %s232_s10, 2048, %s234_s12, %s1234_s14, %s1130_s26, %s1416_s27, %s1418_s28  }
  0x24   : > { %p81_p1 = scmp.ne.s32.totalorder %s1111_s19, %s1107_s18  ;;  %p1420_p2 = scmp.eq.s32.totalorder %s1247_s7, 0 }
  0x25   : > { %p710_p3 = scmp.ge.s32.totalorder %s1127_s23, 1  ;;  %p191_p4 = scmp.lt.s32.totalorder %s1127_s23, 5 }
  0x26   : > { %p1256_p5 = por %p1420_p2, %p81_p1  ;;  %s1133_s10 = smov [#allocation3]  }
  0x27   : > { %p1260_p8 = pnand %p710_p3, %p191_p4  ;;  %s206_s11 = sshll.u32 %s1133_s10, 4  ;;  %s1264_s11 = int_to_ptr.vmem [resolvable:$true] %s206_s11 }
  0x28   : > { %s1427_s8 = scalar_select %p1256_p5, 1, 0 }
  0x29   : > { %p852_p9 = pneg %p1260_p8  ;;  %s715_s18 = sshll.u32 %s1123_s22, 4 }
  0x2a   : > { %s251_s16 = scalar_lea.hbm %s1411_s2, %s715_s18  ;;  %s246_s17 = scalar_lea.vmem [#allocation8], %s1216_s29 }
  0x2b   : > { %s253_s25 = sshll.u32 %s246_s17, 4  ;;  %p1275_p10 = pnand %p852_p9, %p1420_p2  ;;  %s254_s25 = int_to_ptr.vmem [resolvable:$true] %s253_s25 }
  0x2c   : > { %s972_s6 = scalar_lea.vmem %s254_s25, 16  ;;  %s1134_s10 = smov [#allocation8]  }
  0x2d   : > { %p973_p11 = scmp.ne.s32.totalorder %s254_s25, %s972_s6  ;;  %s977_s27 = sshll.u32 %s1134_s10, 4  ;;  %s978_s27 = int_to_ptr.vmem [resolvable:$false] %s977_s27 }
  0x2e   : > { %s979_s28 = scalar_lea.vmem %s978_s27, 32  ;;  %p980_p0 = scmp.lt.s32.totalorder %s254_s25, %s978_s27 }
  0x2f   : > { %p975_p12 = pnand %p973_p11, %p1421_p7  ;;  %p981_p1 = scmp.lt.s32.totalorder %s979_s28, %s972_s6 }
  0x31   : > { %p976_p13 = pneg %p975_p12  ;;  %p982_p3 = por %p981_p1, %p980_p0 }
  0x33   : > { %p983_p4 = pnand %p982_p3, %p976_p13 }
  0x35   : > { %986 = shalt.err (!%p983_p4)
}
  0x36   : > { %862 = dma.hbm_to_vmem [thread:$0]  (!%p1230_p6), %s251_s16, 16, %s254_s25, %s1234_s14  }
  0x37   : > { %p989_p9 = pneg %p1275_p10  ;;  %s998_s18 = scalar_lea.vmem %s1264_s11, 256 }
  0x38   : > { %p999_p11 = scmp.ne.s32.totalorder %s1264_s11, %s998_s18  ;;  %p1006_p7 = scmp.lt.s32.totalorder %s1264_s11, %s1264_s11 }
  0x39   : > { %p1007_p5 = scmp.lt.s32.totalorder %s998_s18, %s998_s18 }
  0x3a   : > { %p1001_p12 = pnand %p999_p11, %p989_p9 }
  0x3b   : > { %p1008_p0 = por %p1007_p5, %p1006_p7 }
  0x3c   : > { %p1002_p2 = pneg %p1001_p12 }
  0x3e   : > { %p1009_p13 = pnand %p1008_p0, %p1002_p2 }
  0x40   : > { %1012 = shalt.err (!%p1009_p13)
}
  0x41   : > { %s1430_s6 = smov 8   ;;  %s1431_s27 = smov 128  }
  0x42   : > { %855 = dma.hbm_to_vmem [thread:$0]  (!%p1275_p10), %s1409_s0, 256, %s1264_s11, [#allocation4], %s1431_s27, %s1431_s27, %s1430_s6  }
  0x43   : > { %s731_s12 = sshll.u32 %s1123_s22, 11  ;;  %s1432_s25 = sshll.u32 %s1216_s29, 7 }
  0x44   : > { %s270_s17 = scalar_lea.hbm %s1412_s3, %s731_s12  ;;  %s264_s10 = scalar_lea.vmem [#allocation9], %s1432_s25 }
  0x45   : > { %s271_s26 = sshll.u32 %s264_s10, 4  ;;  %s261_s18 = scalar_lea.sflag [#allocation10], %s1216_s29  ;;  %s272_s26 = int_to_ptr.vmem [resolvable:$true] %s271_s26 }
  0x46   : > { %s1026_s1 = scalar_lea.vmem %s272_s26, 2048  ;;  %p1433_p2 = pneg %p1230_p6 }
  0x47   : > { %p1027_p7 = scmp.ne.s32.totalorder %s272_s26, %s1026_s1  ;;  %s1135_s28 = smov [#allocation9]  }
  0x48   : > { %s1031_s14 = sshll.u32 %s1135_s28, 4  ;;  %s1032_s14 = int_to_ptr.vmem [resolvable:$false] %s1031_s14 }
  0x49   : > { %p1029_p5 = pnand %p1027_p7, %p1433_p2  ;;  %s1033_s11 = scalar_lea.vmem %s1032_s14, 4096 }
  0x4a   : > { %p1034_p10 = scmp.lt.s32.totalorder %s272_s26, %s1032_s14  ;;  %p1035_p3 = scmp.lt.s32.totalorder %s1033_s11, %s1026_s1 }
  0x4b   : > { %p1030_p1 = pneg %p1029_p5 }
  0x4c   : > { %p1036_p4 = por %p1035_p3, %p1034_p10 }
  0x4e   : > { %p1037_p9 = pnand %p1036_p4, %p1030_p1 }
  0x50   : > { %1040 = shalt.err (!%p1037_p9)
}
  0x51   : > { %865 = dma.hbm_to_vmem [thread:$0]  (!%p1230_p6), %s270_s17, 2048, %s272_s26, %s261_s18, %s1431_s27, %s1431_s27, %s1430_s6  }
  0x52   : > { %283 = sbr.rel (%p1260_p8) target bundleno = 588 (0x24c), region = 40  ;;  %p1434_p11 = scmp.eq.s32.totalorder (!%p1260_p8), %s1247_s7, 0 }
  0x57   : > { %1090 = dma.done.wait (%p1434_p11), [#allocation4], 256   ;;  %p1435_p12 = pmov %p1434_p11 }
  0x58   : > { %s289_s1 = sand.u32 1, %s1247_s7   ;;  %s1323_s29 = sand.u32 1, %s1111_s19  }
  0x59   : > { %1092 = vsyncadd (%p1435_p12), [#allocation4], 4294967040  ;;  %s721_s13 = sshll.u32 %s1323_s29, 7  ;;  %s290_s12 = scalar_lea.sflag [#allocation7], %s289_s1 }
  0x5a   : > { %s1326_s15 = scalar_lea.vmem [#allocation6], %s721_s13  ;;  %p1436_p6 = scmp.ne.s32.totalorder %s1427_s8, 0 }
  0x5c   : > { %1094 = dma.done.wait (%p1436_p6), %s290_s12, 2064  }
  0x5d   : > { %1096 = vsyncadd (%p1436_p6), %s290_s12, 4294965232  ;;  %s301_s9 = scalar_lea.vmem [#allocation8], %s1323_s29  ;;  %s307_s6 = scalar_lea.sflag [#allocation10], %s1323_s29 }
  0x5e   : > { %s1334_s27 = scalar_lea.vmem [#allocation9], %s721_s13 }
  0x5f   : > { %1098 = dma.done.wait (%p1436_p6), %s307_s6, 2048  }
  0x60   : > { %1100 = vsyncadd (%p1436_p6), %s307_s6, 4294965248  ;;  %p723_p8 = scmp.ne.s32.totalorder %s1119_s21, 0 }
  0x62   : > { %347 = sbr.rel (%p723_p8) target bundleno = 105 (0x69), region = 60 }
  0x67   : > { %v1136_v0 = vmov 0.0  }
  0x68   : > { %348 = vst [vmem:[#allocation2] sm:$0xff] %v1136_v0  ;;  %349 = vst [vmem:[#allocation2 + $0x8] sm:$0xff] %v1136_v0 }
  0x69 PF: > { %v367_v1 = vld [vmem:[%s1326_s15 + $0x78] sm:$0xff]  ;;  %v366_v2 = vld [vmem:[%s1326_s15 + $0x70] sm:$0xff]  ;;  %v365_v3 = vld [vmem:[%s1326_s15 + $0x68] sm:$0xff]  ;;  %p725_p0 = scmp.ne.s32.totalorder %s1119_s21, 3 }
  0x6a   : > { %768 = vmatprep.subr.mxu0 %v367_v1  ;;  %v364_v4 = vld [vmem:[%s1326_s15 + $0x60] sm:$0xff]  ;;  %v350_v5 = vld [vmem:[#allocation3] sm:$0xff]  ;;  %v363_v6 = vld [vmem:[%s1326_s15 + $0x58] sm:$0xff] }
  0x6b   : > { %769 = vmatpush3.msra.mxu0 %v367_v1  ;;  %800 = vmatprep.mubr.f32.mxu0 %v350_v5  ;;  %v362_v7 = vld [vmem:[%s1326_s15 + $0x50] sm:$0xff]  ;;  %v361_v8 = vld [vmem:[%s1326_s15 + $0x48] sm:$0xff]  ;;  %v360_v9 = vld [vmem:[%s1326_s15 + $0x40] sm:$0xff] }
  0x6c   : > { %770 = vmatprep.subr.mxu0 %v366_v2  ;;  %v359_v10 = vld [vmem:[%s1326_s15 + $0x38] sm:$0xff]  ;;  %v358_v11 = vld [vmem:[%s1326_s15 + $0x30] sm:$0xff]  ;;  %v357_v12 = vld [vmem:[%s1326_s15 + $0x28] sm:$0xff] }
  0x6d   : > { %771 = vmatpush3.msra.mxu0 %v366_v2  ;;  %v356_v13 = vld [vmem:[%s1326_s15 + $0x20] sm:$0xff]  ;;  %v355_v14 = vld [vmem:[%s1326_s15 + $0x18] sm:$0xff]  ;;  %v354_v15 = vld [vmem:[%s1326_s15 + $0x10] sm:$0xff] }
  0x6e   : > { %772 = vmatprep.subr.mxu0 %v365_v3  ;;  %v353_v16 = vld [vmem:[%s1326_s15 + $0x8] sm:$0xff]  ;;  %v352_v17 = vld [vmem:[%s1326_s15] sm:$0xff]  ;;  %v351_v18 = vld [vmem:[#allocation3 + $0x8] sm:$0xff] }
  0x6f   : > { %773 = vmatpush3.msra.mxu0 %v365_v3  ;;  %v485_v19 = vld [vmem:[%s1334_s27 + $0x78] sm:$0xff]  ;;  %v484_v20 = vld [vmem:[%s1334_s27 + $0x70] sm:$0xff]  ;;  %v483_v21 = vld [vmem:[%s1334_s27 + $0x68] sm:$0xff] }
  0x70   : > { %774 = vmatprep.subr.mxu0 %v364_v4  ;;  %803 = vmatprep.subr.mxu1 %v485_v19  ;;  %v482_v22 = vld [vmem:[%s1334_s27 + $0x60] sm:$0xff]  ;;  %v481_v23 = vld [vmem:[%s1334_s27 + $0x58] sm:$0xff]  ;;  %v480_v24 = vld [vmem:[%s1334_s27 + $0x50] sm:$0xff] }
  0x71   : > { %775 = vmatpush3.msra.mxu0 %v364_v4  ;;  %804 = vmatpush3.msra.mxu1 %v485_v19  ;;  %v479_v25 = vld [vmem:[%s1334_s27 + $0x48] sm:$0xff]  ;;  %v478_v26 = vld [vmem:[%s1334_s27 + $0x40] sm:$0xff]  ;;  %v477_v27 = vld [vmem:[%s1334_s27 + $0x38] sm:$0xff] }
  0x72   : > { %776 = vmatprep.subr.mxu0 %v363_v6  ;;  %805 = vmatprep.subr.mxu1 %v484_v20  ;;  %v476_v28 = vld [vmem:[%s1334_s27 + $0x30] sm:$0xff]  ;;  %v475_v29 = vld [vmem:[%s1334_s27 + $0x28] sm:$0xff]  ;;  %v474_v30 = vld [vmem:[%s1334_s27 + $0x20] sm:$0xff] }
  0x73   : > { %777 = vmatpush3.msra.mxu0 %v363_v6  ;;  %806 = vmatpush3.msra.mxu1 %v484_v20  ;;  %v473_v31 = vld [vmem:[%s1334_s27 + $0x18] sm:$0xff]  ;;  %v472_v32 = vld [vmem:[%s1334_s27 + $0x10] sm:$0xff]  ;;  %v471_v33 = vld [vmem:[%s1334_s27 + $0x8] sm:$0xff] }
  0x74   : > { %778 = vmatprep.subr.mxu0 %v362_v7  ;;  %807 = vmatprep.subr.mxu1 %v483_v21  ;;  %v470_v34 = vld [vmem:[%s1334_s27] sm:$0xff]  ;;  %v724_v35 = vld [vmem:[%s301_s9] ss:$0 sm:$0xff] }
  0x75   : > { %779 = vmatpush3.msra.mxu0 %v362_v7  ;;  %808 = vmatpush3.msra.mxu1 %v483_v21  ;;  %v469_v58 = vld [vmem:[#allocation2 + $0x8] sm:$0xff]  ;;  %v468_v60 = vld [vmem:[#allocation2] sm:$0xff] }
  0x76   : > { %780 = vmatprep.subr.mxu0 %v361_v8  ;;  %809 = vmatprep.subr.mxu1 %v482_v22 }
  0x77   : > { %781 = vmatpush3.msra.mxu0 %v361_v8  ;;  %810 = vmatpush3.msra.mxu1 %v482_v22 }
  0x78   : > { %782 = vmatprep.subr.mxu0 %v360_v9  ;;  %811 = vmatprep.subr.mxu1 %v481_v23 }
  0x79   : > { %783 = vmatpush3.msra.mxu0 %v360_v9  ;;  %812 = vmatpush3.msra.mxu1 %v481_v23 }
  0x7a   : > { %784 = vmatprep.subr.mxu0 %v359_v10  ;;  %813 = vmatprep.subr.mxu1 %v480_v24 }
  0x7b   : > { %785 = vmatpush3.msra.mxu0 %v359_v10  ;;  %814 = vmatpush3.msra.mxu1 %v480_v24 }
  0x7c   : > { %786 = vmatprep.subr.mxu0 %v358_v11  ;;  %815 = vmatprep.subr.mxu1 %v479_v25 }
  0x7d   : > { %787 = vmatpush3.msra.mxu0 %v358_v11  ;;  %816 = vmatpush3.msra.mxu1 %v479_v25 }
  0x7e   : > { %788 = vmatprep.subr.mxu0 %v357_v12  ;;  %817 = vmatprep.subr.mxu1 %v478_v26 }
  0x7f   : > { %789 = vmatpush3.msra.mxu0 %v357_v12  ;;  %818 = vmatpush3.msra.mxu1 %v478_v26 }
  0x80   : > { %790 = vmatprep.subr.mxu0 %v356_v13  ;;  %819 = vmatprep.subr.mxu1 %v477_v27 }
  0x81   : > { %791 = vmatpush3.msra.mxu0 %v356_v13  ;;  %820 = vmatpush3.msra.mxu1 %v477_v27 }
  0x82   : > { %792 = vmatprep.subr.mxu0 %v355_v14  ;;  %821 = vmatprep.subr.mxu1 %v476_v28 }
  0x83   : > { %793 = vmatpush3.msra.mxu0 %v355_v14  ;;  %822 = vmatpush3.msra.mxu1 %v476_v28 }
  0x84   : > { %794 = vmatprep.subr.mxu0 %v354_v15  ;;  %823 = vmatprep.subr.mxu1 %v475_v29 }
  0x85   : > { %795 = vmatpush3.msra.mxu0 %v354_v15  ;;  %824 = vmatpush3.msra.mxu1 %v475_v29 }
  0x86   : > { %796 = vmatprep.subr.mxu0 %v353_v16  ;;  %825 = vmatprep.subr.mxu1 %v474_v30 }
  0x87   : > { %797 = vmatpush3.msra.mxu0 %v353_v16  ;;  %826 = vmatpush3.msra.mxu1 %v474_v30 }
  0x88   : > { %798 = vmatprep.subr.mxu0 %v352_v17  ;;  %827 = vmatprep.subr.mxu1 %v473_v31 }
  0x89   : > { %799 = vmatpush3.msra.mxu0 %v352_v17  ;;  %828 = vmatpush3.msra.mxu1 %v473_v31 }
  0x8a   : > { %801 = vmatmul.mubr.f32.vlgmr.msra.gmra.mxu0 %v351_v18  ;;  %829 = vmatprep.subr.mxu1 %v472_v32 }
  0x8b   : > { %830 = vmatpush3.msra.mxu1 %v472_v32 }
  0x8c   : > { %831 = vmatprep.subr.mxu1 %v471_v33 }
  0x8d   : > { %832 = vmatpush3.msra.mxu1 %v471_v33 }
  0x8e   : > { %833 = vmatprep.subr.mxu1 %v470_v34 }
  0x8f   : > { %834 = vmatpush3.msra.mxu1 %v470_v34 }
 0x14a   : > { %v802_v36 = vpop.f32.mrf.mxu0 }
 0x14b   : > { %v447_v37 = vadd.f32 %v802_v36, %v724_v35 }
 0x14c   : > { %v441_v38 = vpop.f32.mrf.mxu0 }
 0x14d   : > { %v453_v39 = vmul.f32 0.044715, %v447_v37  ;;  %v442_v40 = vadd.f32 %v724_v35, %v441_v38  ;;  %v451_v55 = vmul.f32 0.5, %v447_v37 }
 0x14f   : > { %v455_v41 = vmul.f32 %v453_v39, %v447_v37  ;;  %v452_v42 = vmul.f32 0.044715, %v442_v40  ;;  %v450_v53 = vmul.f32 0.5, %v442_v40 }
 0x151   : > { %v454_v43 = vmul.f32 %v452_v42, %v442_v40  ;;  %v457_v44 = vmul.f32 %v455_v41, %v447_v37 }
 0x153   : > { %v456_v45 = vmul.f32 %v454_v43, %v442_v40  ;;  %v459_v46 = vadd.f32 %v457_v44, %v447_v37 }
 0x155   : > { %v458_v47 = vadd.f32 %v456_v45, %v442_v40  ;;  %v461_v48 = vmul.f32 0.7978846, %v459_v46 }
 0x157   : > { %v460_v49 = vmul.f32 0.7978846, %v458_v47  ;;  %927 = vtanh.f32 %v461_v48 }
 0x159   : > { %929 = vtanh.f32 %v460_v49 }
 0x164   : > { %v928_v50 = vpop.eup %927 }
 0x165   : > { %v465_v52 = vadd.f32 1.0, %v928_v50 }
 0x166   : > { %v930_v51 = vpop.eup %929 }
 0x167   : > { %v464_v54 = vadd.f32 1.0, %v930_v51  ;;  %v467_v57 = vmul.f32 %v465_v52, %v451_v55 }
 0x169   : > { %v466_v56 = vmul.f32 %v464_v54, %v450_v53 }
 0x16b   : > { %835 = vmatprep.mubr.f32.mxu1 %v466_v56 }
 0x16c   : > { %836 = vmatmul.mubr.f32.vlgmr.msra.gmra.mxu1 %v467_v57 }
 0x22c   : > { %v837_v59 = vpop.f32.mrf.mxu1 }
 0x22d   : > { %v562_v61 = vadd.f32 %v837_v59, %v469_v58  ;;  %568 = sbr.rel (%p725_p0) target bundleno = 572 (0x23c), region = 64 }
 0x22e   : > { %v552_v62 = vpop.f32.mrf.mxu1 }
 0x22f   : > { %564 = vst [vmem:[#allocation2 + $0x8] sm:$0xff] %v562_v61  ;;  %v561_v63 = vadd.f32 %v552_v62, %v468_v60 }
 0x231   : > { %563 = vst [vmem:[#allocation2] sm:$0xff] %v561_v63 }
 0x232   : > { %v726_v1 = vld [vmem:[%s1413_s4] ss:$0 sm:$0xff] }
 0x236   : > { %v570_v2 = vld [vmem:[#allocation2 + $0x8] sm:$0xff] }
 0x237   : > { %v579_v4 = vadd.f32 %v726_v1, %v570_v2 }
 0x238   : > { %v569_v0 = vld [vmem:[#allocation2] sm:$0xff] }
 0x239   : > { %v578_v3 = vadd.f32 %v726_v1, %v569_v0  ;;  %581 = vst [vmem:[#allocation11 + $0x8] sm:$0xff] %v579_v4 }
 0x23b   : > { %580 = vst [vmem:[#allocation11] sm:$0xff] %v578_v3 }
 0x23c PF: > { %p869_p13 = scmp.eq.s32.totalorder %s1247_s7, 3  ;;  %s1137_s17 = smov [#allocation11]  }
 0x23d   : > { %s591_s25 = sshll.u32 %s1137_s17, 4  ;;  %s592_s25 = int_to_ptr.vmem [resolvable:$true] %s591_s25 }
 0x23e   : > { %s1041_s10 = scalar_lea.vmem %s592_s25, 256  ;;  %p1048_p1 = scmp.lt.s32.totalorder %s592_s25, %s592_s25 }
 0x23f   : > { %p1042_p7 = scmp.ne.s32.totalorder %s592_s25, %s1041_s10  ;;  %p1049_p10 = scmp.lt.s32.totalorder %s1041_s10, %s1041_s10 }
 0x241   : > { %p1043_p2 = pnand %p1042_p7, %p869_p13  ;;  %p1050_p3 = por %p1049_p10, %p1048_p1 }
 0x243   : > { %p1044_p5 = pneg %p1043_p2 }
 0x245   : > { %p1051_p4 = pnand %p1050_p3, %p1044_p5 }
 0x247   : > { %1054 = shalt.err (!%p1051_p4)
}
 0x248   : > { %s1138_s21 = smov 128   ;;  %s1139_s26 = smov 8  }
 0x249   : > { %849 = dma.vmem_to_hbm [thread:$0]  (%p869_p13), %s592_s25, 256, %s1414_s5, [#allocation5], %s1138_s21, %s1138_s21, %s1139_s26  }
 0x24a   : > { %1102 = dma.done.wait (%p869_p13), [#allocation5], 256  }
 0x24b   : > { %1104 = vsyncadd (%p869_p13), [#allocation5], 4294967040 }
 0x24c PF: > { %s23_s23 = sadd.s32 1, %s1127_s23   ;;  %s1437_s18 = smov %s1111_s19 }
 0x24d   : > { %p20_p9 = scmp.ge.s32.totalorder %s23_s23, 6   ;;  %s1438_s19 = smov %s1115_s20 }
 0x24e   : > { %s1439_s20 = smov %s1219_s30  ;;  %s1440_s21 = smov %s1123_s22 }
 0x24f   : > { %s1441_s22 = smov %s1443_s24  ;;  %22 = sbr.rel (!%p20_p9) target bundleno = 10 (0xa), region = 116 }
 0x254   :  { %607 = vsyncpa [#allocation4], 1 }
 0x255   :  { %609 = vsyncpa [#allocation4 + $0x1], 1 }
 0x256   :  { %610 = vsyncpa [#allocation7], 1 }
 0x257   :  { %612 = vsyncpa [#allocation7 + $0x1], 1 }
 0x258   :  { %613 = vsyncpa [#allocation10], 1 }
 0x259   :  { %615 = vsyncpa [#allocation10 + $0x1], 1 }
 0x25a   :  { %616 = vsyncpa [#allocation5], 1 }
 0x25b   :  { %618 = vsyncpa [#allocation5 + $0x1], 1 }

</bundles_post_ra>
